<compile_context>
chip_gen: v5e
topology: v5e:2x2
jax: 0.10.0
libtpu: 0.0.40
codegen_flags: <defaults>
</compile_context>

<pallas_src>
import jax
import jax.numpy as jnp
from jax.experimental import pallas as pl
from jax.experimental.pallas import tpu as pltpu


def _round_up(x, m):
    return ((x + m - 1) // m) * m


def _linear_kernel(x_ref, w_ref, b_ref, o_ref):
    # MXU matvec: (TB, D) @ (D, 1) -> (TB, 1), f32 accumulation.
    acc = jnp.dot(x_ref[...], w_ref[...], preferred_element_type=jnp.float32)
    o_ref[...] = (acc + b_ref[0]).astype(o_ref.dtype)


def linear_network_forward(state, weight, bias, *, block_rows=None):
    """Forward pass of LinearNetwork (nn.Linear(state_dim, 1)).

    state:  (B, D)  f32 or bf16
    weight: (1, D)  (PyTorch nn.Linear weight layout)
    bias:   (1,)
    returns (B, 1)  f32
    """
    B, D = state.shape
    compute_dtype = state.dtype  # stream the caller's dtype; no HBM-doubling cast
    w_col = jnp.reshape(weight, (D, 1)).astype(compute_dtype)   # one-time layout fixup
    bias = jnp.reshape(bias, (1,)).astype(jnp.float32)          # scalar via SMEM

    # ---- batch-tile sizing (bytes, not rows) -------------------------------
    itemsize = jnp.dtype(compute_dtype).itemsize
    x_bytes_per_row = D * itemsize
    out_bytes_per_row = 512                 # (tb, 1) f32 pads to (tb, 128) in VMEM
    per_buffer_budget = 8 * 1024 * 1024     # x + out per buffer; x2 buffers ~ 16 MiB
    tb = per_buffer_budget // (x_bytes_per_row + out_bytes_per_row)
    tb = max(8, (min(tb, 4096) // 8) * 8)   # row cap keeps the padded out buffer modest
    if block_rows is not None:              # optional manual override / test hook
        tb = max(8, (min(tb, block_rows) // 8) * 8)
    tb = min(tb, _round_up(B, 8))           # never bigger than the (rounded) batch
    # Keep >=4 grid steps for large batches (pipelining + 2-TC sharding on v7x),
    # but never shrink tiles below 512 rows to do so.
    if B >= 4 * 512:
        tb = min(tb, max(512, _round_up(pl.cdiv(B, 4), 8)))

    grid = (pl.cdiv(B, tb),)

    # TODO(synk): for very large D (8-row min tile > VMEM) add a K-split grid
    # axis with an f32 accumulator (pl.when init/finalize).
    out = pl.pallas_call(
        _linear_kernel,
        out_shape=jax.ShapeDtypeStruct((B, 1), jnp.float32),
        grid_spec=pltpu.PrefetchScalarGridSpec(
            num_scalar_prefetch=0,
            grid=grid,
            in_specs=[
                # x batch tile: pipelined / double-buffered across the grid.
                pl.BlockSpec((tb, D), lambda i: (i, 0)),
                # weight column: constant block index -> DMA'd once.
                pl.BlockSpec((D, 1), lambda i: (0, 0)),
                # bias as a scalar in SMEM (no VMEM tile, no per-step DMA).
                pl.BlockSpec(memory_space=pltpu.MemorySpace.SMEM),
            ],
            out_specs=pl.BlockSpec((tb, 1), lambda i: (i, 0)),
        ),
        compiler_params=pltpu.CompilerParams(
            # Independent batch tiles. ("parallel" is neutral on single-TC
            # v5e/v6e; CORE_PARALLEL could be used on v7x for 2-TC sharding.)
            dimension_semantics=("parallel",),
            vmem_limit_bytes=32 * 1024 * 1024,
        ),
    )(state, w_col, bias)

    return out


def init_linear_params(state_dim, seed=0):
    # Deterministic init matching nn.Linear's default scheme:
    # U(-1/sqrt(in_features), 1/sqrt(in_features)) for weight and bias.
    key = jax.random.PRNGKey(seed)
    k_w, k_b = jax.random.split(key)
    bound = 1.0 / jnp.sqrt(jnp.float32(state_dim))
    weight = jax.random.uniform(
        k_w, (1, state_dim), jnp.float32, minval=-bound, maxval=bound
    )
    bias = jax.random.uniform(
        k_b, (1,), jnp.float32, minval=-bound, maxval=bound
    )
    return weight, bias


if __name__ == "__main__":
    key = jax.random.PRNGKey(0)
    k_x1, k_x2 = jax.random.split(key)

    # Case 1: toy shape implied by the module (batch=8, state_dim=32).
    batch, state_dim = 8, 32
    state = jax.random.normal(k_x1, (batch, state_dim), jnp.float32)
    weight, bias = init_linear_params(state_dim, seed=0)

    out = jax.block_until_ready(linear_network_forward(state, weight, bias))
    ref = state @ weight.T + bias
    assert out.shape == (batch, 1)
    assert jnp.allclose(out, ref, atol=1e-5, rtol=1e-5)

    # Case 2: ragged batch, multi-tile grid (exercises the unpadded tail block).
    batch2, state_dim2 = 300, 128
    state2 = jax.random.normal(k_x2, (batch2, state_dim2), jnp.float32)
    weight2, bias2 = init_linear_params(state_dim2, seed=1)

    out2 = jax.block_until_ready(
        linear_network_forward(state2, weight2, bias2, block_rows=128)
    )
    ref2 = state2 @ weight2.T + bias2
    assert out2.shape == (batch2, 1)
    assert jnp.allclose(out2, ref2, atol=1e-5, rtol=1e-4)

    print("KERNEL_OK")
</pallas_src>

<mosaic_0001>
module attributes {stable_mosaic.version = 11 : i64} {
  func.func @_linear_kernel(%arg0: i32, %arg1: memref<8x32xf32, #tpu.memory_space<vmem>>, %arg2: memref<32x1xf32, #tpu.memory_space<vmem>>, %arg3: memref<1xf32, #tpu.memory_space<smem>>, %arg4: memref<8x1xf32, #tpu.memory_space<vmem>>) attributes {dimension_semantics = [#tpu.dimension_semantics<parallel>], iteration_bounds = array<i64: 1>, scalar_prefetch = 0 : i64, scratch_operands = 0 : i64, tpu.core_type = #tpu.core_type<tc>, window_params = [{transform_indices = @transform_0, window_bounds = array<i64: 8, 32>}, {pipeline_mode = #tpu.pipeline_mode<synchronous>, transform_indices = @transform_1, window_bounds = array<i64: 32, 1>}, {transform_indices = @transform_2, window_bounds = array<i64: 1>}, {transform_indices = @transform_3, window_bounds = array<i64: 8, 1>}]} {
    %c0 = arith.constant 0 : index
    %c0_0 = arith.constant 0 : index
    %0 = vector.load %arg1[%c0, %c0_0] : memref<8x32xf32, #tpu.memory_space<vmem>>, vector<8x32xf32>
    %c0_1 = arith.constant 0 : index
    %c0_2 = arith.constant 0 : index
    %1 = vector.load %arg2[%c0_1, %c0_2] : memref<32x1xf32, #tpu.memory_space<vmem>>, vector<32x1xf32>
    %cst = arith.constant dense<0.000000e+00> : vector<8x1xf32>
    %2 = tpu.matmul %0, %1, %cst {dimension_numbers = #tpu.dot_dimension_numbers<[1], [0], [0], [1], [0, 0, 1, 1], [], []>} : vector<8x32xf32>, vector<32x1xf32>, vector<8x1xf32> -> vector<8x1xf32>
    %c0_3 = arith.constant 0 : index
    %3 = memref.load %arg3[%c0_3] : memref<1xf32, #tpu.memory_space<smem>>
    %4 = vector.broadcast %3 : f32 to vector<8x1xf32>
    %5 = arith.addf %2, %4 : vector<8x1xf32>
    %c0_4 = arith.constant 0 : index
    %c0_5 = arith.constant 0 : index
    %6 = vector.load %arg4[%c0_4, %c0_5] : memref<8x1xf32, #tpu.memory_space<vmem>>, vector<8x1xf32>
    tpu.vector_store %arg4[%c0_4, %c0_5], %5 {strides = array<i32>} : memref<8x1xf32, #tpu.memory_space<vmem>>, vector<8x1xf32>,
    return
  }
  func.func @transform_0(%arg0: i32) -> (i32, i32) {
    %c0_i32 = arith.constant 0 : i32
    %c0_i32_0 = arith.constant 0 : i32
    return %arg0, %c0_i32 : i32, i32
  }
  func.func @transform_1(%arg0: i32) -> (i32, i32) {
    %c0_i32 = arith.constant 0 : i32
    %c0_i32_0 = arith.constant 0 : i32
    %c0_i32_1 = arith.constant 0 : i32
    return %c0_i32, %c0_i32_0 : i32, i32
  }
  func.func @transform_2(%arg0: i32) -> i32 {
    %c0_i32 = arith.constant 0 : i32
    %c0_i32_0 = arith.constant 0 : i32
    return %c0_i32 : i32
  }
  func.func @transform_3(%arg0: i32) -> (i32, i32) {
    %c0_i32 = arith.constant 0 : i32
    %c0_i32_0 = arith.constant 0 : i32
    return %arg0, %c0_i32 : i32, i32
  }
}

</mosaic_0001>

<bundles_post_ra>
// kernel: tpu_custom_call.1
= control target key start
LH: loop header
LB: loop body
LE: loop exit
PB: predicated region body
PF: predicated region fallthrough
CT: control target
= control target key end

     0   :  { %vm22_vm0 = vcmask 261120   ;;  %vm46_vm1 = vcmask 7168   ;;  %s94_s1 = inlined_call_operand.vmem [shape: f32[32,1], index: 1, kind: input, shape index: {}]   ;;  %s95_s0 = inlined_call_operand.vmem [shape: f32[8,32], index: 0, kind: input, shape index: {}]   ;;  %s96_s2 = inlined_call_operand.<no memory space> [shape: f32[1], index: 2, kind: input, shape index: {}]   ;;  %s97_s3 = inlined_call_operand.vmem [shape: f32[8,1], index: 3, kind: output, shape index: {}]  }
   0x1   :  { %v19_v0 = vld [vmem:[%s94_s1 + $0x18] sm:$0xff]  ;;  %v18_v1 = vld [vmem:[%s94_s1 + $0x10] sm:$0xff]  ;;  %v17_v2 = vld [vmem:[%s94_s1 + $0x8] sm:$0xff]  ;;  %v21_v5 = vstv %s96_s2 }
   0x2   :  { %38 = vmatpush.msra.mxu0 %v19_v0  ;;  %v16_v3 = vld [vmem:[%s94_s1] sm:$0xff] }
   0x3   :  { %v15_v4 = vld [vmem:[%s95_s0] sm:$0xff] }
   0x4   :  { %39 = vmatpush.msra.mxu0 %v18_v1 }
   0x6   :  { %40 = vmatpush.msra.mxu0 %v17_v2 }
   0x8   :  { %41 = vmatpush.msra.mxu0 %v16_v3 }
   0x9   :  { %52 = vmatmul.msk.f32.vlgmr.msra.gmra.mxu0 %vm22_vm0, %v15_v4 }
  0x86   :  { %v43_v6 = vpop.f32.mrf.mxu0 }
  0x87   :  { %v44_v7 = vadd.f32 %v43_v6, %v21_v5 }
  0x89   :  { %47 = vst.msk [vmem:[%s97_s3] sm:$0xff] %vm46_vm1, %v44_v7 }

</bundles_post_ra>
